<compile_context>
chip_gen: v5e
topology: v5e:2x2
jax: 0.10.0
libtpu: 0.0.40
codegen_flags: <defaults>
</compile_context>

<pallas_src>
import jax
import jax.numpy as jnp
from jax.experimental import pallas as pl
from jax.experimental.pallas import tpu as pltpu


def linear_kernel(x_ref, p_ref, o_ref):
    # x_ref: (N, 2) f32 in VMEM  — activations
    # p_ref: (3, 3) f32 in VMEM  — rows 0..1 = W^T (in_features x out_features),
    #                              row 2     = bias
    # o_ref: (N, 3) f32 in VMEM
    x = x_ref[...]                                      # (N, 2)
    # K=2 contraction as two broadcast-FMAs + bias, single full-tile store.
    o_ref[...] = (x[:, 0:1] * p_ref[0:1, :]             # (N,1)*(1,3) -> (N,3)
                  + x[:, 1:2] * p_ref[1:2, :]
                  + p_ref[2:3, :])


def pallas_linear(x2d, params):
    """x2d: (N, in=2), params: (3, out=3) packed [W^T; b] -> (N, out=3)."""
    n = x2d.shape[0]
    out_f = params.shape[1]
    bytes_accessed = (x2d.size + params.size + n * out_f) * 4
    return pl.pallas_call(
        linear_kernel,
        out_shape=jax.ShapeDtypeStruct((n, out_f), jnp.float32),
        in_specs=[
            pl.BlockSpec(memory_space=pltpu.MemorySpace.VMEM),   # x (whole array)
            pl.BlockSpec(memory_space=pltpu.MemorySpace.VMEM),   # packed params
        ],
        out_specs=pl.BlockSpec(memory_space=pltpu.MemorySpace.VMEM),
        cost_estimate=pl.CostEstimate(
            flops=4 * n * out_f,        # 2 mul + 1 add + 1 bias add per output
            transcendentals=0,
            bytes_accessed=bytes_accessed,
        ),
    )(x2d, params)


@jax.jit
def model_forward(x, weight, bias):
    # x: (4, 3, 2) -> flatten -> regroup into rows of in_features: (12, 2)
    x2d = x.reshape(-1, weight.shape[1])
    # Pack [W^T; b] into a single (in+1, out) = (3, 3) operand.
    params = jnp.concatenate([weight.T, bias[None, :]], axis=0)
    return pallas_linear(x2d, params)   # (12, 3)


if __name__ == "__main__":
    key = jax.random.PRNGKey(0)
    kx, kw, kb = jax.random.split(key, 3)

    # Input consistent with the module: torch.randn(4, 3, 2)
    x = jax.random.normal(kx, (4, 3, 2), dtype=jnp.float32)

    # Deterministic Linear(2, 3) parameters (PyTorch-style uniform init)
    in_features, out_features = 2, 3
    bound = 1.0 / (in_features ** 0.5)
    weight = jax.random.uniform(
        kw, (out_features, in_features), minval=-bound, maxval=bound,
        dtype=jnp.float32)
    bias = jax.random.uniform(
        kb, (out_features,), minval=-bound, maxval=bound, dtype=jnp.float32)

    out = model_forward(x, weight, bias)
    out = jax.block_until_ready(out)

    # Sanity check against plain-JAX reference
    ref = x.reshape(-1, in_features) @ weight.T + bias
    assert out.shape == (12, 3)
    assert jnp.allclose(out, ref, atol=1e-5, rtol=1e-5)

    print("KERNEL_OK")
</pallas_src>

<mosaic_0001>
module attributes {stable_mosaic.version = 11 : i64} {
  func.func @linear_kernel(%arg0: memref<12x2xf32, #tpu.memory_space<vmem>>, %arg1: memref<3x3xf32, #tpu.memory_space<vmem>>, %arg2: memref<12x3xf32, #tpu.memory_space<vmem>>) attributes {dimension_semantics = [], scalar_prefetch = 0 : i64, scratch_operands = 0 : i64, tpu.core_type = #tpu.core_type<tc>} {
    %c0 = arith.constant 0 : index
    %c0_0 = arith.constant 0 : index
    %0 = vector.load %arg0[%c0, %c0_0] : memref<12x2xf32, #tpu.memory_space<vmem>>, vector<12x2xf32>
    %1 = vector.extract_strided_slice %0 {offsets = [0, 0], sizes = [12, 1], strides = [1, 1]} : vector<12x2xf32> to vector<12x1xf32>
    %c0_1 = arith.constant 0 : index
    %c0_2 = arith.constant 0 : index
    %2 = vector.load %arg1[%c0_1, %c0_2] : memref<3x3xf32, #tpu.memory_space<vmem>>, vector<1x3xf32>
    %3 = vector.broadcast %1 : vector<12x1xf32> to vector<12x3xf32>
    %4 = vector.broadcast %2 : vector<1x3xf32> to vector<12x3xf32>
    %5 = arith.mulf %3, %4 : vector<12x3xf32>
    %6 = vector.extract_strided_slice %0 {offsets = [0, 1], sizes = [12, 1], strides = [1, 1]} : vector<12x2xf32> to vector<12x1xf32>
    %c1 = arith.constant 1 : index
    %c0_3 = arith.constant 0 : index
    %7 = vector.load %arg1[%c1, %c0_3] : memref<3x3xf32, #tpu.memory_space<vmem>>, vector<1x3xf32>
    %8 = vector.broadcast %6 : vector<12x1xf32> to vector<12x3xf32>
    %9 = vector.broadcast %7 : vector<1x3xf32> to vector<12x3xf32>
    %10 = arith.mulf %8, %9 : vector<12x3xf32>
    %11 = arith.addf %5, %10 : vector<12x3xf32>
    %c2 = arith.constant 2 : index
    %c0_4 = arith.constant 0 : index
    %12 = vector.load %arg1[%c2, %c0_4] : memref<3x3xf32, #tpu.memory_space<vmem>>, vector<1x3xf32>
    %13 = vector.broadcast %12 : vector<1x3xf32> to vector<12x3xf32>
    %14 = arith.addf %11, %13 : vector<12x3xf32>
    %c0_5 = arith.constant 0 : index
    %c0_6 = arith.constant 0 : index
    %15 = vector.load %arg2[%c0_5, %c0_6] : memref<12x3xf32, #tpu.memory_space<vmem>>, vector<12x3xf32>
    tpu.vector_store %arg2[%c0_5, %c0_6], %14 {strides = array<i32>} : memref<12x3xf32, #tpu.memory_space<vmem>>, vector<12x3xf32>,
    return
  }
}

</mosaic_0001>

<bundles_post_ra>
// kernel: model_forward.1
= control target key start
LH: loop header
LB: loop body
LE: loop exit
PB: predicated region body
PF: predicated region fallthrough
CT: control target
= control target key end

     0   :  { %v61_v0 = vmov 1   ;;  %v62_v1 = vmov 0   ;;  %vm45_vm0 = vcmask 23552   ;;  %vm47_vm1 = vcmask 19456   ;;  %s99_s0 = inlined_call_operand.vmem [shape: f32[12,2], index: 0, kind: input, shape index: {}]   ;;  %s100_s1 = inlined_call_operand.vmem [shape: f32[3,3], index: 1, kind: input, shape index: {}]   ;;  %s101_s2 = inlined_call_operand.vmem [shape: f32[12,3], index: 2, kind: output, shape index: {}]  }
   0x1   :  { %56 = vset.pattern.permute.xlu1 %v61_v0  ;;  %55 = vset.pattern.permute.xlu0 %v62_v1  ;;  %v11_v2 = vld [vmem:[%s99_s0] sm:$0xff]  ;;  %v12_v3 = vld [vmem:[%s99_s0 + $0x8] sm:$0xf] }
   0x2   :  { %29 = vperm.xlu1 %56, %v11_v2   ;;  %16 = vperm.xlu0 %55, %v11_v2   ;;  %v58_v4 = vld [vmem:[%s100_s1 + $0x1] ss:$0 sm:$0xff]  ;;  %v59_v5 = vld [vmem:[%s100_s1] ss:$0 sm:$0xff]  ;;  %v60_v9 = vld [vmem:[%s100_s1 + $0x2] ss:$0 sm:$0xff] }
   0xa   :  { %33 = vperm.xlu1 %56, %v12_v3   ;;  %21 = vperm.xlu0 %55, %v12_v3  }
  0x12   :  { %57 = vset.pattern.permute.xlu0 %v61_v0 }
  0x74   :  { %v30_v6 = vpop.permute.xlu1 %29  ;;  %v17_v7 = vpop.permute.xlu0 %16 }
  0x75   :  { %v37_v8 = vmul.f32 %v58_v4, %v30_v6  ;;  %v25_v10 = vmul.f32 %v59_v5, %v17_v7 }
  0x77   :  { %v39_v11 = vadd.f32 %v37_v8, %v25_v10 }
  0x79   :  { %v43_v12 = vadd.f32 %v60_v9, %v39_v11 }
  0x7b   :  { %46 = vst.msk [vmem:[%s101_s2] sm:$0xff] %vm45_vm0, %v43_v12 }
  0x7c   :  { %v34_v13 = vpop.permute.xlu1 %33  ;;  %v22_v14 = vpop.permute.xlu0 %21 }
  0x7d   :  { %v38_v15 = vmul.f32 %v58_v4, %v34_v13  ;;  %v26_v16 = vmul.f32 %v59_v5, %v22_v14 }
  0x7f   :  { %v40_v17 = vadd.f32 %v38_v15, %v26_v16 }
  0x81   :  { %v44_v18 = vadd.f32 %v60_v9, %v40_v17 }
  0x83   :  { %48 = vst.msk [vmem:[%s101_s2 + $0x8] sm:$0xf] %vm47_vm1, %v44_v18 }

</bundles_post_ra>
